<compile_context>
chip_gen: v6e
topology: v6e:2x2x1
jax: 0.10.0
libtpu: 0.0.40
codegen_flags: <defaults>
</compile_context>

<pallas_src>
import functools

import jax
import jax.numpy as jnp
from jax.experimental import pallas as pl
from jax.experimental.pallas import tpu as pltpu

MULTIPLIER = 5.0
CLAMP_LO = -60.0
CLAMP_HI = 60.0
OFFSET = 0.2

LANE = 128
MAX_WIDTH = 8192


def _softplus_kernel(x_ref, o_ref, *, compute_dtype):
    x = x_ref[...].astype(compute_dtype)
    z = jnp.clip(MULTIPLIER * x, CLAMP_LO, CLAMP_HI)   # multiplier + limit
    # log1p(tanh(z)) -> -inf for large negative z, matching the fp32 reference.
    o_ref[...] = (OFFSET + jnp.log1p(jnp.tanh(z))).astype(o_ref.dtype)


def _device_info():
    """(num_tensorcores, target_block_bytes_per_array, has_bf16_eup)."""
    kind = ""
    try:
        kind = jax.devices()[0].device_kind.lower()
    except Exception:
        pass
    is_v7 = ("v7" in kind) or ("7x" in kind)
    has_bf16_eup = ("v6" in kind) or is_v7          # v5e has no bf16 EUP
    num_tc = 2 if is_v7 else 1                      # v7x: 2 TCs per chip
    target_block_bytes = (4 if is_v7 else 2) * 1024 * 1024
    return num_tc, target_block_bytes, has_bf16_eup


def _pick_width(n, packing):
    """Largest multiple-of-128 divisor of n, preferring rows >= packing."""
    best_any = None
    for w in range(MAX_WIDTH, LANE - 1, -LANE):
        if n % w == 0:
            if best_any is None:
                best_any = w
            if n // w >= packing:        # sublane-dense tiles
                return w
    return best_any if best_any is not None else LANE


def _choose_block_rows(rows, width, itemsize, packing, num_tc, target_bytes):
    """Block rows: ~target_bytes per array per step, packed-sublane aligned."""
    row_bytes = width * itemsize
    max_block_rows = max(packing, (target_bytes // row_bytes) // packing * packing)
    if rows <= max_block_rows:
        # Fits in one block. Split in two only on 2-TC chips (v7x) when there
        # is enough work; on single-TC chips the extra step is pure overhead.
        if num_tc >= 2 and rows >= 2 * packing:
            return min(rows, pl.cdiv(pl.cdiv(rows, 2), packing) * packing)
        return rows                       # full-extent block (always legal)
    block_rows = max_block_rows
    if num_tc >= 2:
        # Keep the number of blocks even so both TensorCores stay balanced.
        nblocks = pl.cdiv(rows, block_rows)
        if nblocks % 2:
            nblocks += 1
            block_rows = min(max_block_rows,
                             max(packing,
                                 pl.cdiv(pl.cdiv(rows, nblocks), packing) * packing))
    return block_rows


def _run_pallas(x2d, orig_dtype, compute_dtype, block_rows):
    rows, width = x2d.shape
    itemsize = jnp.dtype(orig_dtype).itemsize
    n = rows * width
    kernel = functools.partial(_softplus_kernel, compute_dtype=compute_dtype)
    return pl.pallas_call(
        kernel,
        out_shape=jax.ShapeDtypeStruct((rows, width), orig_dtype),
        grid_spec=pltpu.PrefetchScalarGridSpec(
            num_scalar_prefetch=0,
            grid=(pl.cdiv(rows, block_rows),),
            in_specs=[pl.BlockSpec((block_rows, width), lambda i: (i, 0))],
            out_specs=pl.BlockSpec((block_rows, width), lambda i: (i, 0)),
        ),
        compiler_params=pltpu.CompilerParams(
            dimension_semantics=("parallel",),
            vmem_limit_bytes=32 * 1024 * 1024,
        ),
        cost_estimate=pl.CostEstimate(
            flops=4 * n,
            transcendentals=2 * n,
            bytes_accessed=2 * n * itemsize,
        ),
    )(x2d)


def _jnp_softplus(x, compute_dtype):
    z = jnp.clip(MULTIPLIER * x.astype(compute_dtype), CLAMP_LO, CLAMP_HI)
    return (OFFSET + jnp.log1p(jnp.tanh(z))).astype(x.dtype)


def softplus_pallas(x: jax.Array) -> jax.Array:
    """Applies the custom SoftPlus elementwise; arbitrary input shape."""
    orig_shape = x.shape
    orig_dtype = x.dtype
    n = x.size
    if n == 0:
        return x

    itemsize = jnp.dtype(orig_dtype).itemsize
    packing = max(8, 32 // max(1, itemsize))        # 8 f32, 16 bf16, 32 i8/fp8
    num_tc, target_block_bytes, has_bf16_eup = _device_info()
    compute_dtype = (jnp.bfloat16
                     if (orig_dtype == jnp.bfloat16 and has_bf16_eup)
                     else jnp.float32)

    flat = x.reshape(-1)

    if n < LANE:
        # Tiny input: single full-extent (1, n) block (legal for any n).
        x2d = flat.reshape(1, n)
        out_flat = _run_pallas(x2d, orig_dtype, compute_dtype, 1).reshape(-1)
        return out_flat.reshape(orig_shape)

    main_len = (n // LANE) * LANE
    tail = None
    if main_len != n:
        # Awkward size: process the 128-divisible prefix in the kernel and the
        # <128-element tail with a tiny jnp op (no whole-array pad + slice).
        main = flat[:main_len]
        tail = flat[main_len:]
    else:
        main = flat

    width = _pick_width(main_len, packing)
    rows = main_len // width
    block_rows = _choose_block_rows(rows, width, itemsize, packing,
                                    num_tc, target_block_bytes)

    out_main = _run_pallas(main.reshape(rows, width), orig_dtype,
                           compute_dtype, block_rows).reshape(-1)

    if tail is not None:
        out_flat = jnp.concatenate([out_main, _jnp_softplus(tail, compute_dtype)])
    else:
        out_flat = out_main
    return out_flat.reshape(orig_shape)


def _reference(x: jax.Array) -> jax.Array:
    z = jnp.clip(MULTIPLIER * x.astype(jnp.float32), CLAMP_LO, CLAMP_HI)
    return (OFFSET + jnp.log1p(jnp.tanh(z))).astype(x.dtype)


if __name__ == "__main__":
    key = jax.random.PRNGKey(0)
    # NCHW-like input (module is shape-agnostic / elementwise).
    x = jax.random.normal(key, (2, 4, 16, 16), dtype=jnp.float32)

    y = softplus_pallas(x)
    jax.block_until_ready(y)

    y_ref = _reference(x)
    assert y.shape == x.shape and y.dtype == x.dtype
    # -inf saturation (x <~ -1.8) matches in both kernel and reference;
    # allclose treats equal infinities as equal.
    assert jnp.allclose(y, y_ref, atol=1e-5, rtol=1e-5)

    print("KERNEL_OK")
</pallas_src>

<mosaic_0001>
module attributes {stable_mosaic.version = 11 : i64} {
  func.func @_softplus_kernel(%arg0: i32, %arg1: memref<8x256xf32, #tpu.memory_space<vmem>>, %arg2: memref<8x256xf32, #tpu.memory_space<vmem>>) attributes {dimension_semantics = [#tpu.dimension_semantics<parallel>], iteration_bounds = array<i64: 1>, scalar_prefetch = 0 : i64, scratch_operands = 0 : i64, tpu.core_type = #tpu.core_type<tc>, window_params = [{transform_indices = @transform_0, window_bounds = array<i64: 8, 256>}, {transform_indices = @transform_1, window_bounds = array<i64: 8, 256>}]} {
    %c0 = arith.constant 0 : index
    %c0_0 = arith.constant 0 : index
    %0 = vector.load %arg1[%c0, %c0_0] : memref<8x256xf32, #tpu.memory_space<vmem>>, vector<8x256xf32>
    %cst = arith.constant 5.000000e+00 : f32
    %1 = vector.broadcast %cst : f32 to vector<8x256xf32>
    %2 = arith.mulf %1, %0 : vector<8x256xf32>
    %cst_1 = arith.constant -6.000000e+01 : f32
    %cst_2 = arith.constant 6.000000e+01 : f32
    %3 = vector.broadcast %cst_1 : f32 to vector<8x256xf32>
    %4 = arith.maximumf %3, %2 : vector<8x256xf32>
    %5 = vector.broadcast %cst_2 : f32 to vector<8x256xf32>
    %6 = arith.minimumf %5, %4 : vector<8x256xf32>
    %7 = math.tanh %6 : vector<8x256xf32>
    %8 = math.log1p %7 : vector<8x256xf32>
    %cst_3 = arith.constant 2.000000e-01 : f32
    %9 = vector.broadcast %cst_3 : f32 to vector<8x256xf32>
    %10 = arith.addf %9, %8 : vector<8x256xf32>
    %c0_4 = arith.constant 0 : index
    %c0_5 = arith.constant 0 : index
    %11 = vector.load %arg2[%c0_4, %c0_5] : memref<8x256xf32, #tpu.memory_space<vmem>>, vector<8x256xf32>
    tpu.vector_store %arg2[%c0_4, %c0_5], %10 {strides = array<i32>} : memref<8x256xf32, #tpu.memory_space<vmem>>, vector<8x256xf32>,
    return
  }
  func.func @transform_0(%arg0: i32) -> (i32, i32) {
    %c0_i32 = arith.constant 0 : i32
    %c0_i32_0 = arith.constant 0 : i32
    return %arg0, %c0_i32 : i32, i32
  }
  func.func @transform_1(%arg0: i32) -> (i32, i32) {
    %c0_i32 = arith.constant 0 : i32
    %c0_i32_0 = arith.constant 0 : i32
    return %arg0, %c0_i32 : i32, i32
  }
}

</mosaic_0001>

<bundles_post_ra>
// kernel: tpu_custom_call.1
= control target key start
LH: loop header
LB: loop body
LE: loop exit
PB: predicated region body
PF: predicated region fallthrough
CT: control target
= control target key end

     0   :  { %6 = vsyncpa [#allocation3], 0  ;;  %s142_s0 = inlined_call_operand.hbm [shape: f32[8,256], index: 0, kind: input, shape index: {}]   ;;  %s143_s1 = inlined_call_operand.hbm [shape: f32[8,256], index: 1, kind: output, shape index: {}]  }
   0x1   :  { %7 = vsyncpa [#allocation4], 0  ;;  %s124_s6 = smov [#allocation2]  }
   0x2   :  { %s14_s7 = sshll.u32 %s124_s6, 4  ;;  %s15_s7 = int_to_ptr.vmem [resolvable:$true] %s14_s7 }
   0x3   :  { %s88_s8 = scalar_lea.vmem %s15_s7, 256  ;;  %p93_p1 = scmp.lt.s32.totalorder %s15_s7, %s15_s7 }
   0x4   :  { %p89_p0 = scmp.ne.s32.totalorder %s15_s7, %s88_s8  ;;  %p94_p2 = scmp.lt.s32.totalorder %s88_s8, %s88_s8 }
   0x6   :  { %p95_p3 = por %p94_p2, %p93_p1 }
   0x8   :  { %p96_p4 = pnand %p95_p3, %p89_p0 }
   0xa   :  { %99 = shalt.err (!%p96_p4)
}
   0xb   :  { %17 = dma.hbm_to_vmem [thread:$0]  %s142_s0, 256, %s15_s7, [#allocation3]  }
   0xc   :  { %120 = dma.done.wait [#allocation3], 256  }
   0xd   :  { %121 = vsyncadd [#allocation3], 4294967040  ;;  %v21_v0 = vld [vmem:[#allocation2] sm:$0xff]  ;;  %v22_v1 = vld [vmem:[#allocation2 + $0x8] sm:$0xff]  ;;  %s125_s0 = smov [#allocation5]  }
   0xe   :  { %v23_v2 = vmul.f32 5.0, %v21_v0  ;;  %v24_v3 = vmul.f32 5.0, %v22_v1  ;;  %s59_s11 = sshll.u32 %s125_s0, 4  ;;  %s60_s11 = int_to_ptr.vmem [resolvable:$true] %s59_s11 }
   0xf   :  { %s100_s12 = scalar_lea.vmem %s60_s11, 256  ;;  %p105_p6 = scmp.lt.s32.totalorder %s60_s11, %s60_s11 }
  0x10   :  { %v68_v4 = vclamps-f32 %v23_v2, 60.0  ;;  %v69_v5 = vclamps-f32 %v24_v3, 60.0  ;;  %p101_p5 = scmp.ne.s32.totalorder %s60_s11, %s100_s12  ;;  %p106_p7 = scmp.lt.s32.totalorder %s100_s12, %s100_s12 }
  0x12   :  { %72 = vtanh.f32 %v68_v4  ;;  %p107_p8 = por %p106_p7, %p105_p6 }
  0x13   :  { %74 = vtanh.f32 %v69_v5 }
  0x14   :  { %p108_p9 = pnand %p107_p8, %p101_p5 }
  0x1f   :  { %v73_v6 = vpop.eup %72 }
  0x20   :  { %v75_v7 = vpop.eup %74  ;;  %v31_v8 = vadd.f32 1.0, %v73_v6  ;;  %v34_v10 = vmul.f32 -0.5, %v73_v6  ;;  %v37_v13 = vand.u32 2147483647, %v73_v6 }
  0x21   :  { %v40_v9 = vadd.f32 1.0, %v75_v7  ;;  %v43_v11 = vmul.f32 -0.5, %v75_v7  ;;  %v46_v15 = vand.u32 2147483647, %v75_v7 }
  0x22   :  { %76 = vlog2.f32 %v31_v8  ;;  %v35_v12 = vadd.f32 1.0, %v34_v10  ;;  %vm38_vm0 = vcmp.lt.f32.partialorder %v37_v13, 0.0004427343 }
  0x23   :  { %78 = vlog2.f32 %v40_v9  ;;  %v44_v14 = vadd.f32 1.0, %v43_v11  ;;  %vm47_vm1 = vcmp.lt.f32.partialorder %v46_v15, 0.0004427343 }
  0x24   :  { %v36_v16 = vmul.f32 %v73_v6, %v35_v12 }
  0x25   :  { %v45_v18 = vmul.f32 %v75_v7, %v44_v14 }
  0x2f   :  { %v77_v17 = vpop.eup %76 }
  0x30   :  { %v79_v19 = vpop.eup %78  ;;  %v33_v20 = vmul.f32 0.6931472, %v77_v17 }
  0x31   :  { %v42_v21 = vmul.f32 0.6931472, %v79_v19 }
  0x32   :  { %v39_v22 = vsel %vm38_vm0, %v36_v16, %v33_v20 }
  0x33   :  { %v49_v23 = vadd.f32 0.2, %v39_v22  ;;  %v48_v24 = vsel %vm47_vm1, %v45_v18, %v42_v21 }
  0x34   :  { %v50_v25 = vadd.f32 0.2, %v48_v24 }
  0x35   :  { %51 = vst [vmem:[#allocation5] sm:$0xff] %v49_v23 }
  0x36   :  { %52 = vst [vmem:[#allocation5 + $0x8] sm:$0xff] %v50_v25 }
  0x37   :  { %111 = shalt.err (!%p108_p9)
}
  0x38   :  { %62 = dma.vmem_to_hbm [thread:$0]  %s60_s11, 256, %s143_s1, [#allocation4]  }
  0x39   :  { %122 = dma.done.wait [#allocation4], 256  }
  0x3a   :  { %123 = vsyncadd [#allocation4], 4294967040 }
  0x3b   :  { %66 = vsyncpa [#allocation3], 1 }
  0x3c   :  { %67 = vsyncpa [#allocation4], 1 }

</bundles_post_ra>
